<compile_context>
chip_gen: v7x
topology: tpu7x:2x2x1
jax: 0.10.0
libtpu: 0.0.40
codegen_flags: <defaults>
</compile_context>

<pallas_src>
import functools

import jax
import jax.numpy as jnp
from jax.experimental import pallas as pl
from jax.experimental.pallas import tpu as pltpu

LN_EPS = 1e-5


def _pick_block_m(m, target=512):
    """Largest row-block <= target that divides M (multiple of 8), else M."""
    if m <= target:
        return m
    for bm in range(target - target % 8, 7, -8):
        if m % bm == 0:
            return bm
    return m


# --------------------------------------------------------------------------
# Kernels
# --------------------------------------------------------------------------
def _linear_kernel(x_ref, w_ref, b_ref, o_ref):
    """o = x @ w + b   (used for the fused QKV projection)."""
    acc = jnp.dot(x_ref[...], w_ref[...], preferred_element_type=jnp.float32)
    acc = acc + b_ref[...].astype(jnp.float32)
    o_ref[...] = acc.astype(o_ref.dtype)


def _matmul_add_ln_kernel(x_ref, w_ref, b_ref, res_ref, g_ref, beta_ref, o_ref,
                          *, eps):
    """o = LayerNorm(res + x @ w + b)   (out_proj + residual + LN fused)."""
    y = jnp.dot(x_ref[...], w_ref[...], preferred_element_type=jnp.float32)
    y = y + b_ref[...].astype(jnp.float32) + res_ref[...].astype(jnp.float32)
    mu = jnp.mean(y, axis=-1, keepdims=True)
    var = jnp.mean((y - mu) * (y - mu), axis=-1, keepdims=True)
    yn = (y - mu) * jax.lax.rsqrt(var + eps)
    yn = yn * g_ref[...].astype(jnp.float32) + beta_ref[...].astype(jnp.float32)
    o_ref[...] = yn.astype(o_ref.dtype)


def _ffn_add_ln_kernel(x_ref, w1_ref, b1_ref, w2_ref, b2_ref, g_ref, beta_ref,
                       o_ref, *, eps):
    """o = LayerNorm(x + relu(x@w1+b1) @ w2 + b2)  (FFN fully fused)."""
    x = x_ref[...].astype(jnp.float32)
    h = jnp.dot(x, w1_ref[...], preferred_element_type=jnp.float32)
    h = jnp.maximum(h + b1_ref[...].astype(jnp.float32), 0.0)
    y = jnp.dot(h.astype(w2_ref.dtype), w2_ref[...],
                preferred_element_type=jnp.float32)
    y = y + b2_ref[...].astype(jnp.float32) + x
    mu = jnp.mean(y, axis=-1, keepdims=True)
    var = jnp.mean((y - mu) * (y - mu), axis=-1, keepdims=True)
    yn = (y - mu) * jax.lax.rsqrt(var + eps)
    yn = yn * g_ref[...].astype(jnp.float32) + beta_ref[...].astype(jnp.float32)
    o_ref[...] = yn.astype(o_ref.dtype)


def _attn_kernel(qkv_ref, bias_ref, o_ref, *, num_heads, head_dim):
    """Per-batch attention, all heads in one invocation, lane-dense output.

    qkv_ref : (T, 3C) with q|k|v concatenated along lanes (scale pre-folded).
    bias_ref: (H, T, T) additive attention bias.
    o_ref   : (T, C).
    """
    C = num_heads * head_dim
    qkv = qkv_ref[...].astype(jnp.float32)
    q = qkv[:, 0:C]
    k = qkv[:, C:2 * C]
    v = qkv[:, 2 * C:3 * C]

    outs = []
    for h in range(num_heads):          # static unroll over heads
        sl = slice(h * head_dim, (h + 1) * head_dim)
        s = jnp.dot(q[:, sl], k[:, sl].T, preferred_element_type=jnp.float32)
        s = s + bias_ref[h].astype(jnp.float32)
        m = jnp.max(s, axis=-1, keepdims=True)
        p = jnp.exp(s - m)
        l = jnp.sum(p, axis=-1, keepdims=True)
        p = p * pl.reciprocal(l, approx=True)     # EUP slot, frees VALU
        outs.append(jnp.dot(p, v[:, sl], preferred_element_type=jnp.float32))
    o_ref[...] = jnp.concatenate(outs, axis=-1).astype(o_ref.dtype)


# --------------------------------------------------------------------------
# pallas_call wrappers
# --------------------------------------------------------------------------
def fused_linear(x, w, b, *, block_m=512):
    M, K = x.shape
    N = w.shape[1]
    bm = _pick_block_m(M, block_m)
    return pl.pallas_call(
        _linear_kernel,
        out_shape=jax.ShapeDtypeStruct((M, N), x.dtype),
        grid=(M // bm,),
        in_specs=[
            pl.BlockSpec((bm, K), lambda i: (i, 0)),
            pl.BlockSpec((K, N), lambda i: (0, 0)),
            pl.BlockSpec((1, N), lambda i: (0, 0)),
        ],
        out_specs=pl.BlockSpec((bm, N), lambda i: (i, 0)),
        compiler_params=pltpu.CompilerParams(
            dimension_semantics=("parallel",)),
    )(x, w, b.reshape(1, N))


def matmul_add_ln(x, w, b, residual, gamma, beta, *, eps=LN_EPS, block_m=512):
    M, K = x.shape
    N = w.shape[1]
    bm = _pick_block_m(M, block_m)
    return pl.pallas_call(
        functools.partial(_matmul_add_ln_kernel, eps=eps),
        out_shape=jax.ShapeDtypeStruct((M, N), x.dtype),
        grid=(M // bm,),
        in_specs=[
            pl.BlockSpec((bm, K), lambda i: (i, 0)),
            pl.BlockSpec((K, N), lambda i: (0, 0)),
            pl.BlockSpec((1, N), lambda i: (0, 0)),
            pl.BlockSpec((bm, N), lambda i: (i, 0)),
            pl.BlockSpec((1, N), lambda i: (0, 0)),
            pl.BlockSpec((1, N), lambda i: (0, 0)),
        ],
        out_specs=pl.BlockSpec((bm, N), lambda i: (i, 0)),
        compiler_params=pltpu.CompilerParams(
            dimension_semantics=("parallel",)),
    )(x, w, b.reshape(1, N), residual, gamma.reshape(1, N), beta.reshape(1, N))


def ffn_add_ln(x, w1, b1, w2, b2, gamma, beta, *, eps=LN_EPS, block_m=512):
    M, C = x.shape
    F = w1.shape[1]
    bm = _pick_block_m(M, block_m)
    # TODO(synk): for production sizes (C=768, F=3072) on v7x (64 MiB VMEM),
    # tile the F/K dimensions of w1/w2 (or hold bf16 copies) instead of
    # keeping both f32 weights fully resident per block.
    return pl.pallas_call(
        functools.partial(_ffn_add_ln_kernel, eps=eps),
        out_shape=jax.ShapeDtypeStruct((M, C), x.dtype),
        grid=(M // bm,),
        in_specs=[
            pl.BlockSpec((bm, C), lambda i: (i, 0)),
            pl.BlockSpec((C, F), lambda i: (0, 0)),
            pl.BlockSpec((1, F), lambda i: (0, 0)),
            pl.BlockSpec((F, C), lambda i: (0, 0)),
            pl.BlockSpec((1, C), lambda i: (0, 0)),
            pl.BlockSpec((1, C), lambda i: (0, 0)),
            pl.BlockSpec((1, C), lambda i: (0, 0)),
        ],
        out_specs=pl.BlockSpec((bm, C), lambda i: (i, 0)),
        compiler_params=pltpu.CompilerParams(
            dimension_semantics=("parallel",)),
    )(x, w1, b1.reshape(1, F), w2, b2.reshape(1, C),
      gamma.reshape(1, C), beta.reshape(1, C))


def attention(qkv, bias, *, num_heads):
    # qkv: (B, T, 3C), bias: (B, H, T, T)  ->  (B, T, C)
    B, T, C3 = qkv.shape
    C = C3 // 3
    H = num_heads
    d = C // H
    return pl.pallas_call(
        functools.partial(_attn_kernel, num_heads=H, head_dim=d),
        out_shape=jax.ShapeDtypeStruct((B, T, C), qkv.dtype),
        grid=(B,),
        in_specs=[
            pl.BlockSpec((None, T, C3), lambda b: (b, 0, 0)),
            pl.BlockSpec((None, H, T, T), lambda b: (b, 0, 0, 0)),
        ],
        out_specs=pl.BlockSpec((None, T, C), lambda b: (b, 0, 0)),
        compiler_params=pltpu.CompilerParams(
            dimension_semantics=("parallel",)),
    )(qkv, bias)


# --------------------------------------------------------------------------
# Layer wrapper
# --------------------------------------------------------------------------
def transformer_m_encoder_layer(x, attn_bias, params, *, num_heads):
    """x: (T, B, C), attn_bias: (B, H, T, T) -> ((T, B, C), None)."""
    T, B, C = x.shape
    H = num_heads  # static Python int

    # Work in batch-major (B*T, C) layout: one transpose in, one out.
    xb = jnp.transpose(x, (1, 0, 2)).reshape(B * T, C)

    # --- self-attention block (scale already folded into wqkv/bqkv) --------
    qkv = fused_linear(xb, params["wqkv"], params["bqkv"])            # (B*T, 3C)
    attn_out = attention(qkv.reshape(B, T, 3 * C), attn_bias,
                         num_heads=H)                                 # (B, T, C)
    attn_out = attn_out.reshape(B * T, C)

    # out_proj + residual + post-LN fused (dropout identity in eval)
    x1 = matmul_add_ln(attn_out, params["wo"], params["bo"], xb,
                       params["ln1_g"], params["ln1_b"])              # (B*T, C)

    # --- FFN block: fc1 + relu + fc2 + residual + post-LN fused -------------
    out = ffn_add_ln(x1, params["w1"], params["b1"],
                     params["w2"], params["b2"],
                     params["ln2_g"], params["ln2_b"])                # (B*T, C)

    out = jnp.transpose(out.reshape(B, T, C), (1, 0, 2))              # (T, B, C)
    return out, None  # need_weights=False -> attn is None


# --------------------------------------------------------------------------
# Deterministic parameter init + demo
# --------------------------------------------------------------------------
def init_params(key, embed_dim, ffn_dim, num_heads):
    keys = jax.random.split(key, 6)
    C, F = embed_dim, ffn_dim
    d = C // num_heads
    scale = float(d) ** -0.5

    def w(k, shape, s=0.05):
        return (s * jax.random.normal(k, shape)).astype(jnp.float32)

    wq, wk, wv = w(keys[0], (C, C)), w(keys[1], (C, C)), w(keys[2], (C, C))
    bq = jnp.zeros((C,), jnp.float32)
    bk = jnp.zeros((C,), jnp.float32)
    bv = jnp.zeros((C,), jnp.float32)

    # Fold the fairseq MHA scaling (q = q_proj(x) * d**-0.5) into wq AND bq,
    # and fuse the three projections into a single (C, 3C) weight.
    wqkv = jnp.concatenate([wq * scale, wk, wv], axis=1)              # (C, 3C)
    bqkv = jnp.concatenate([bq * scale, bk, bv], axis=0)              # (3C,)

    return {
        "wqkv": wqkv, "bqkv": bqkv,
        "wo": w(keys[3], (C, C)), "bo": jnp.zeros((C,), jnp.float32),
        "ln1_g": jnp.ones((C,), jnp.float32),
        "ln1_b": jnp.zeros((C,), jnp.float32),
        "w1": w(keys[4], (C, F)), "b1": jnp.zeros((F,), jnp.float32),
        "w2": w(keys[5], (F, C)), "b2": jnp.zeros((C,), jnp.float32),
        "ln2_g": jnp.ones((C,), jnp.float32),
        "ln2_b": jnp.zeros((C,), jnp.float32),
    }


if __name__ == "__main__":
    # Small shapes consistent with the module's forward:
    #   seq T=8, batch B=2, embed C=32, heads H=4 (head_dim 8), ffn F=64.
    T, B, C, H, F = 8, 2, 32, 4, 64

    root = jax.random.PRNGKey(0)
    k_x, k_bias, k_p = jax.random.split(root, 3)

    x = jax.random.normal(k_x, (T, B, C), dtype=jnp.float32)
    attn_bias = 0.1 * jax.random.normal(k_bias, (B, H, T, T), dtype=jnp.float32)
    params = init_params(k_p, C, F, H)

    # TODO(synk): attn_mask / key_padding_mask paths are not exercised (passed
    # as None in this synthetic setup); only additive attn_bias is implemented.

    layer = jax.jit(functools.partial(transformer_m_encoder_layer, num_heads=H))
    out, attn = layer(x, attn_bias, params)
    out = jax.block_until_ready(out)

    assert out.shape == (T, B, C) and attn is None
    assert bool(jnp.all(jnp.isfinite(out)))
    print("KERNEL_OK")
</pallas_src>

<mosaic_0001>
module attributes {stable_mosaic.version = 11 : i64} {
  func.func @_linear_kernel(%arg0: i32, %arg1: memref<16x32xf32, #tpu.memory_space<vmem>>, %arg2: memref<32x96xf32, #tpu.memory_space<vmem>>, %arg3: memref<1x96xf32, #tpu.memory_space<vmem>>, %arg4: memref<16x96xf32, #tpu.memory_space<vmem>>) attributes {dimension_semantics = [#tpu.dimension_semantics<parallel>], iteration_bounds = array<i64: 1>, scalar_prefetch = 0 : i64, scratch_operands = 0 : i64, tpu.core_type = #tpu.core_type<tc>, window_params = [{transform_indices = @transform_0, window_bounds = array<i64: 16, 32>}, {pipeline_mode = #tpu.pipeline_mode<synchronous>, transform_indices = @transform_1, window_bounds = array<i64: 32, 96>}, {pipeline_mode = #tpu.pipeline_mode<synchronous>, transform_indices = @transform_2, window_bounds = array<i64: 1, 96>}, {transform_indices = @transform_3, window_bounds = array<i64: 16, 96>}]} {
    %c0 = arith.constant 0 : index
    %c0_0 = arith.constant 0 : index
    %0 = vector.load %arg1[%c0, %c0_0] : memref<16x32xf32, #tpu.memory_space<vmem>>, vector<16x32xf32>
    %c0_1 = arith.constant 0 : index
    %c0_2 = arith.constant 0 : index
    %1 = vector.load %arg2[%c0_1, %c0_2] : memref<32x96xf32, #tpu.memory_space<vmem>>, vector<32x96xf32>
    %cst = arith.constant dense<0.000000e+00> : vector<16x96xf32>
    %2 = tpu.matmul %0, %1, %cst {dimension_numbers = #tpu.dot_dimension_numbers<[1], [0], [0], [1], [0, 0, 1, 1], [], []>} : vector<16x32xf32>, vector<32x96xf32>, vector<16x96xf32> -> vector<16x96xf32>
    %c0_3 = arith.constant 0 : index
    %c0_4 = arith.constant 0 : index
    %3 = vector.load %arg3[%c0_3, %c0_4] : memref<1x96xf32, #tpu.memory_space<vmem>>, vector<1x96xf32>
    %4 = vector.broadcast %3 : vector<1x96xf32> to vector<16x96xf32>
    %5 = arith.addf %2, %4 : vector<16x96xf32>
    %c0_5 = arith.constant 0 : index
    %c0_6 = arith.constant 0 : index
    %6 = vector.load %arg4[%c0_5, %c0_6] : memref<16x96xf32, #tpu.memory_space<vmem>>, vector<16x96xf32>
    tpu.vector_store %arg4[%c0_5, %c0_6], %5 {strides = array<i32>} : memref<16x96xf32, #tpu.memory_space<vmem>>, vector<16x96xf32>,
    return
  }
  func.func @transform_0(%arg0: i32) -> (i32, i32) {
    %c0_i32 = arith.constant 0 : i32
    %c0_i32_0 = arith.constant 0 : i32
    return %arg0, %c0_i32 : i32, i32
  }
  func.func @transform_1(%arg0: i32) -> (i32, i32) {
    %c0_i32 = arith.constant 0 : i32
    %c0_i32_0 = arith.constant 0 : i32
    %c0_i32_1 = arith.constant 0 : i32
    return %c0_i32, %c0_i32_0 : i32, i32
  }
  func.func @transform_2(%arg0: i32) -> (i32, i32) {
    %c0_i32 = arith.constant 0 : i32
    %c0_i32_0 = arith.constant 0 : i32
    %c0_i32_1 = arith.constant 0 : i32
    return %c0_i32, %c0_i32_0 : i32, i32
  }
  func.func @transform_3(%arg0: i32) -> (i32, i32) {
    %c0_i32 = arith.constant 0 : i32
    %c0_i32_0 = arith.constant 0 : i32
    return %arg0, %c0_i32 : i32, i32
  }
}

module attributes {stable_mosaic.version = 11 : i64} {
  func.func @_matmul_add_ln_kernel(%arg0: i32, %arg1: memref<16x32xf32, #tpu.memory_space<vmem>>, %arg2: memref<32x32xf32, #tpu.memory_space<vmem>>, %arg3: memref<1x32xf32, #tpu.memory_space<vmem>>, %arg4: memref<16x32xf32, #tpu.memory_space<vmem>>, %arg5: memref<1x32xf32, #tpu.memory_space<vmem>>, %arg6: memref<1x32xf32, #tpu.memory_space<vmem>>, %arg7: memref<16x32xf32, #tpu.memory_space<vmem>>) attributes {dimension_semantics = [#tpu.dimension_semantics<parallel>], iteration_bounds = array<i64: 1>, scalar_prefetch = 0 : i64, scratch_operands = 0 : i64, tpu.core_type = #tpu.core_type<tc>, window_params = [{transform_indices = @transform_0, window_bounds = array<i64: 16, 32>}, {pipeline_mode = #tpu.pipeline_mode<synchronous>, transform_indices = @transform_1, window_bounds = array<i64: 32, 32>}, {pipeline_mode = #tpu.pipeline_mode<synchronous>, transform_indices = @transform_2, window_bounds = array<i64: 1, 32>}, {transform_indices = @transform_3, window_bounds = array<i64: 16, 32>}, {pipeline_mode = #tpu.pipeline_mode<synchronous>, transform_indices = @transform_4, window_bounds = array<i64: 1, 32>}, {pipeline_mode = #tpu.pipeline_mode<synchronous>, transform_indices = @transform_5, window_bounds = array<i64: 1, 32>}, {transform_indices = @transform_6, window_bounds = array<i64: 16, 32>}]} {
    %c0 = arith.constant 0 : index
    %c0_0 = arith.constant 0 : index
    %0 = vector.load %arg1[%c0, %c0_0] : memref<16x32xf32, #tpu.memory_space<vmem>>, vector<16x32xf32>
    %c0_1 = arith.constant 0 : index
    %c0_2 = arith.constant 0 : index
    %1 = vector.load %arg2[%c0_1, %c0_2] : memref<32x32xf32, #tpu.memory_space<vmem>>, vector<32x32xf32>
    %cst = arith.constant dense<0.000000e+00> : vector<16x32xf32>
    %2 = tpu.matmul %0, %1, %cst {dimension_numbers = #tpu.dot_dimension_numbers<[1], [0], [0], [1], [0, 0, 1, 1], [], []>} : vector<16x32xf32>, vector<32x32xf32>, vector<16x32xf32> -> vector<16x32xf32>
    %c0_3 = arith.constant 0 : index
    %c0_4 = arith.constant 0 : index
    %3 = vector.load %arg3[%c0_3, %c0_4] : memref<1x32xf32, #tpu.memory_space<vmem>>, vector<1x32xf32>
    %4 = vector.broadcast %3 : vector<1x32xf32> to vector<16x32xf32>
    %5 = arith.addf %2, %4 : vector<16x32xf32>
    %c0_5 = arith.constant 0 : index
    %c0_6 = arith.constant 0 : index
    %6 = vector.load %arg4[%c0_5, %c0_6] : memref<16x32xf32, #tpu.memory_space<vmem>>, vector<16x32xf32>
    %7 = arith.addf %5, %6 : vector<16x32xf32>
    %cst_7 = arith.constant dense<0.000000e+00> : vector<16xf32>
    %8 = vector.multi_reduction <add>, %7, %cst_7 [1] : vector<16x32xf32> to vector<16xf32>
    %9 = vector.shape_cast %8 : vector<16xf32> to vector<16x1xf32>
    %cst_8 = arith.constant 3.200000e+01 : f32
    %10 = vector.broadcast %cst_8 : f32 to vector<16x1xf32>
    %11 = arith.divf %9, %10 : vector<16x1xf32>
    %12 = vector.broadcast %11 : vector<16x1xf32> to vector<16x32xf32>
    %13 = arith.subf %7, %12 : vector<16x32xf32>
    %14 = vector.broadcast %11 : vector<16x1xf32> to vector<16x32xf32>
    %15 = arith.subf %7, %14 : vector<16x32xf32>
    %16 = arith.mulf %13, %15 : vector<16x32xf32>
    %cst_9 = arith.constant dense<0.000000e+00> : vector<16xf32>
    %17 = vector.multi_reduction <add>, %16, %cst_9 [1] : vector<16x32xf32> to vector<16xf32>
    %18 = vector.shape_cast %17 : vector<16xf32> to vector<16x1xf32>
    %cst_10 = arith.constant 3.200000e+01 : f32
    %19 = vector.broadcast %cst_10 : f32 to vector<16x1xf32>
    %20 = arith.divf %18, %19 : vector<16x1xf32>
    %21 = vector.broadcast %11 : vector<16x1xf32> to vector<16x32xf32>
    %22 = arith.subf %7, %21 : vector<16x32xf32>
    %cst_11 = arith.constant 9.99999974E-6 : f32
    %23 = vector.broadcast %cst_11 : f32 to vector<16x1xf32>
    %24 = arith.addf %20, %23 : vector<16x1xf32>
    %25 = math.rsqrt %24 : vector<16x1xf32>
    %26 = vector.broadcast %25 : vector<16x1xf32> to vector<16x32xf32>
    %27 = arith.mulf %22, %26 : vector<16x32xf32>
    %c0_12 = arith.constant 0 : index
    %c0_13 = arith.constant 0 : index
    %28 = vector.load %arg5[%c0_12, %c0_13] : memref<1x32xf32, #tpu.memory_space<vmem>>, vector<1x32xf32>
    %29 = vector.broadcast %28 : vector<1x32xf32> to vector<16x32xf32>
    %30 = arith.mulf %27, %29 : vector<16x32xf32>
    %c0_14 = arith.constant 0 : index
    %c0_15 = arith.constant 0 : index
    %31 = vector.load %arg6[%c0_14, %c0_15] : memref<1x32xf32, #tpu.memory_space<vmem>>, vector<1x32xf32>
    %32 = vector.broadcast %31 : vector<1x32xf32> to vector<16x32xf32>
    %33 = arith.addf %30, %32 : vector<16x32xf32>
    %c0_16 = arith.constant 0 : index
    %c0_17 = arith.constant 0 : index
    %34 = vector.load %arg7[%c0_16, %c0_17] : memref<16x32xf32, #tpu.memory_space<vmem>>, vector<16x32xf32>
    tpu.vector_store %arg7[%c0_16, %c0_17], %33 {strides = array<i32>} : memref<16x32xf32, #tpu.memory_space<vmem>>, vector<16x32xf32>,
    return
  }
  func.func @transform_0(%arg0: i32) -> (i32, i32) {
    %c0_i32 = arith.constant 0 : i32
    %c0_i32_0 = arith.constant 0 : i32
    return %arg0, %c0_i32 : i32, i32
  }
  func.func @transform_1(%arg0: i32) -> (i32, i32) {
    %c0_i32 = arith.constant 0 : i32
    %c0_i32_0 = arith.constant 0 : i32
    %c0_i32_1 = arith.constant 0 : i32
    return %c0_i32, %c0_i32_0 : i32, i32
  }
  func.func @transform_2(%arg0: i32) -> (i32, i32) {
    %c0_i32 = arith.constant 0 : i32
    %c0_i32_0 = arith.constant 0 : i32
    %c0_i32_1 = arith.constant 0 : i32
    return %c0_i32, %c0_i32_0 : i32, i32
  }
  func.func @transform_3(%arg0: i32) -> (i32, i32) {
    %c0_i32 = arith.constant 0 : i32
    %c0_i32_0 = arith.constant 0 : i32
    return %arg0, %c0_i32 : i32, i32
  }
  func.func @transform_4(%arg0: i32) -> (i32, i32) {
    %c0_i32 = arith.constant 0 : i32
    %c0_i32_0 = arith.constant 0 : i32
    %c0_i32_1 = arith.constant 0 : i32
    return %c0_i32, %c0_i32_0 : i32, i32
  }
  func.func @transform_5(%arg0: i32) -> (i32, i32) {
    %c0_i32 = arith.constant 0 : i32
    %c0_i32_0 = arith.constant 0 : i32
    %c0_i32_1 = arith.constant 0 : i32
    return %c0_i32, %c0_i32_0 : i32, i32
  }
  func.func @transform_6(%arg0: i32) -> (i32, i32) {
    %c0_i32 = arith.constant 0 : i32
    %c0_i32_0 = arith.constant 0 : i32
    return %arg0, %c0_i32 : i32, i32
  }
}

module attributes {stable_mosaic.version = 11 : i64} {
  func.func @_attn_kernel(%arg0: i32, %arg1: memref<1x8x96xf32, #tpu.memory_space<vmem>>, %arg2: memref<1x4x8x8xf32, #tpu.memory_space<vmem>>, %arg3: memref<1x8x32xf32, #tpu.memory_space<vmem>>) attributes {dimension_semantics = [#tpu.dimension_semantics<parallel>], iteration_bounds = array<i64: 2>, scalar_prefetch = 0 : i64, scratch_operands = 0 : i64, tpu.core_type = #tpu.core_type<tc>, window_params = [{transform_indices = @transform_0, window_bounds = array<i64: 1, 8, 96>}, {transform_indices = @transform_1, window_bounds = array<i64: 1, 4, 8, 8>}, {transform_indices = @transform_2, window_bounds = array<i64: 1, 8, 32>}]} {
    %c0 = arith.constant 0 : index
    %c0_0 = arith.constant 0 : index
    %c0_1 = arith.constant 0 : index
    %0 = vector.load %arg1[%c0, %c0_0, %c0_1] : memref<1x8x96xf32, #tpu.memory_space<vmem>>, vector<1x8x96xf32>
    %1 = vector.shape_cast %0 : vector<1x8x96xf32> to vector<8x96xf32>
    %2 = vector.extract_strided_slice %1 {offsets = [0, 0], sizes = [8, 32], strides = [1, 1]} : vector<8x96xf32> to vector<8x32xf32>
    %3 = vector.extract_strided_slice %1 {offsets = [0, 32], sizes = [8, 32], strides = [1, 1]} : vector<8x96xf32> to vector<8x32xf32>
    %4 = vector.extract_strided_slice %1 {offsets = [0, 64], sizes = [8, 32], strides = [1, 1]} : vector<8x96xf32> to vector<8x32xf32>
    %5 = vector.extract_strided_slice %2 {offsets = [0, 0], sizes = [8, 8], strides = [1, 1]} : vector<8x32xf32> to vector<8x8xf32>
    %6 = vector.extract_strided_slice %3 {offsets = [0, 0], sizes = [8, 8], strides = [1, 1]} : vector<8x32xf32> to vector<8x8xf32>
    %7 = tpu.transpose %6, [1, 0] : vector<8x8xf32> -> vector<8x8xf32>
    %cst = arith.constant dense<0.000000e+00> : vector<8x8xf32>
    %8 = tpu.matmul %5, %7, %cst {dimension_numbers = #tpu.dot_dimension_numbers<[1], [0], [0], [1], [0, 0, 1, 1], [], []>} : vector<8x8xf32>, vector<8x8xf32>, vector<8x8xf32> -> vector<8x8xf32>
    %c0_2 = arith.constant 0 : index
    %c0_3 = arith.constant 0 : index
    %c0_4 = arith.constant 0 : index
    %c0_5 = arith.constant 0 : index
    %9 = vector.load %arg2[%c0_2, %c0_3, %c0_4, %c0_5] : memref<1x4x8x8xf32, #tpu.memory_space<vmem>>, vector<1x1x8x8xf32>
    %10 = vector.shape_cast %9 : vector<1x1x8x8xf32> to vector<8x8xf32>
    %11 = arith.addf %8, %10 : vector<8x8xf32>
    %cst_6 = arith.constant dense<0xFF800000> : vector<8xf32>
    %12 = vector.multi_reduction <maximumf>, %11, %cst_6 [1] : vector<8x8xf32> to vector<8xf32>
    %13 = vector.shape_cast %12 : vector<8xf32> to vector<8x1xf32>
    %14 = vector.broadcast %13 : vector<8x1xf32> to vector<8x8xf32>
    %15 = arith.subf %11, %14 : vector<8x8xf32>
    %16 = math.exp %15 : vector<8x8xf32>
    %cst_7 = arith.constant dense<0.000000e+00> : vector<8xf32>
    %17 = vector.multi_reduction <add>, %16, %cst_7 [1] : vector<8x8xf32> to vector<8xf32>
    %18 = vector.shape_cast %17 : vector<8xf32> to vector<8x1xf32>
    %19 = tpu.reciprocal %18 {approx = true} : vector<8x1xf32> -> vector<8x1xf32>
    %20 = vector.broadcast %19 : vector<8x1xf32> to vector<8x8xf32>
    %21 = arith.mulf %16, %20 : vector<8x8xf32>
    %22 = vector.extract_strided_slice %4 {offsets = [0, 0], sizes = [8, 8], strides = [1, 1]} : vector<8x32xf32> to vector<8x8xf32>
    %cst_8 = arith.constant dense<0.000000e+00> : vector<8x8xf32>
    %23 = tpu.matmul %21, %22, %cst_8 {dimension_numbers = #tpu.dot_dimension_numbers<[1], [0], [0], [1], [0, 0, 1, 1], [], []>} : vector<8x8xf32>, vector<8x8xf32>, vector<8x8xf32> -> vector<8x8xf32>
    %24 = vector.extract_strided_slice %2 {offsets = [0, 8], sizes = [8, 8], strides = [1, 1]} : vector<8x32xf32> to vector<8x8xf32>
    %25 = vector.extract_strided_slice %3 {offsets = [0, 8], sizes = [8, 8], strides = [1, 1]} : vector<8x32xf32> to vector<8x8xf32>
    %26 = tpu.transpose %25, [1, 0] : vector<8x8xf32> -> vector<8x8xf32>
    %cst_9 = arith.constant dense<0.000000e+00> : vector<8x8xf32>
    %27 = tpu.matmul %24, %26, %cst_9 {dimension_numbers = #tpu.dot_dimension_numbers<[1], [0], [0], [1], [0, 0, 1, 1], [], []>} : vector<8x8xf32>, vector<8x8xf32>, vector<8x8xf32> -> vector<8x8xf32>
    %c0_10 = arith.constant 0 : index
    %c1 = arith.constant 1 : index
    %c0_11 = arith.constant 0 : index
    %c0_12 = arith.constant 0 : index
    %28 = vector.load %arg2[%c0_10, %c1, %c0_11, %c0_12] : memref<1x4x8x8xf32, #tpu.memory_space<vmem>>, vector<1x1x8x8xf32>
    %29 = vector.shape_cast %28 : vector<1x1x8x8xf32> to vector<8x8xf32>
    %30 = arith.addf %27, %29 : vector<8x8xf32>
    %cst_13 = arith.constant dense<0xFF800000> : vector<8xf32>
    %31 = vector.multi_reduction <maximumf>, %30, %cst_13 [1] : vector<8x8xf32> to vector<8xf32>
    %32 = vector.shape_cast %31 : vector<8xf32> to vector<8x1xf32>
    %33 = vector.broadcast %32 : vector<8x1xf32> to vector<8x8xf32>
    %34 = arith.subf %30, %33 : vector<8x8xf32>
    %35 = math.exp %34 : vector<8x8xf32>
    %cst_14 = arith.constant dense<0.000000e+00> : vector<8xf32>
    %36 = vector.multi_reduction <add>, %35, %cst_14 [1] : vector<8x8xf32> to vector<8xf32>
    %37 = vector.shape_cast %36 : vector<8xf32> to vector<8x1xf32>
    %38 = tpu.reciprocal %37 {approx = true} : vector<8x1xf32> -> vector<8x1xf32>
    %39 = vector.broadcast %38 : vector<8x1xf32> to vector<8x8xf32>
    %40 = arith.mulf %35, %39 : vector<8x8xf32>
    %41 = vector.extract_strided_slice %4 {offsets = [0, 8], sizes = [8, 8], strides = [1, 1]} : vector<8x32xf32> to vector<8x8xf32>
    %cst_15 = arith.constant dense<0.000000e+00> : vector<8x8xf32>
    %42 = tpu.matmul %40, %41, %cst_15 {dimension_numbers = #tpu.dot_dimension_numbers<[1], [0], [0], [1], [0, 0, 1, 1], [], []>} : vector<8x8xf32>, vector<8x8xf32>, vector<8x8xf32> -> vector<8x8xf32>
    %43 = vector.extract_strided_slice %2 {offsets = [0, 16], sizes = [8, 8], strides = [1, 1]} : vector<8x32xf32> to vector<8x8xf32>
    %44 = vector.extract_strided_slice %3 {offsets = [0, 16], sizes = [8, 8], strides = [1, 1]} : vector<8x32xf32> to vector<8x8xf32>
    %45 = tpu.transpose %44, [1, 0] : vector<8x8xf32> -> vector<8x8xf32>
    %cst_16 = arith.constant dense<0.000000e+00> : vector<8x8xf32>
    %46 = tpu.matmul %43, %45, %cst_16 {dimension_numbers = #tpu.dot_dimension_numbers<[1], [0], [0], [1], [0, 0, 1, 1], [], []>} : vector<8x8xf32>, vector<8x8xf32>, vector<8x8xf32> -> vector<8x8xf32>
    %c0_17 = arith.constant 0 : index
    %c2 = arith.constant 2 : index
    %c0_18 = arith.constant 0 : index
    %c0_19 = arith.constant 0 : index
    %47 = vector.load %arg2[%c0_17, %c2, %c0_18, %c0_19] : memref<1x4x8x8xf32, #tpu.memory_space<vmem>>, vector<1x1x8x8xf32>
    %48 = vector.shape_cast %47 : vector<1x1x8x8xf32> to vector<8x8xf32>
    %49 = arith.addf %46, %48 : vector<8x8xf32>
    %cst_20 = arith.constant dense<0xFF800000> : vector<8xf32>
    %50 = vector.multi_reduction <maximumf>, %49, %cst_20 [1] : vector<8x8xf32> to vector<8xf32>
    %51 = vector.shape_cast %50 : vector<8xf32> to vector<8x1xf32>
    %52 = vector.broadcast %51 : vector<8x1xf32> to vector<8x8xf32>
    %53 = arith.subf %49, %52 : vector<8x8xf32>
    %54 = math.exp %53 : vector<8x8xf32>
    %cst_21 = arith.constant dense<0.000000e+00> : vector<8xf32>
    %55 = vector.multi_reduction <add>, %54, %cst_21 [1] : vector<8x8xf32> to vector<8xf32>
    %56 = vector.shape_cast %55 : vector<8xf32> to vector<8x1xf32>
    %57 = tpu.reciprocal %56 {approx = true} : vector<8x1xf32> -> vector<8x1xf32>
    %58 = vector.broadcast %57 : vector<8x1xf32> to vector<8x8xf32>
    %59 = arith.mulf %54, %58 : vector<8x8xf32>
    %60 = vector.extract_strided_slice %4 {offsets = [0, 16], sizes = [8, 8], strides = [1, 1]} : vector<8x32xf32> to vector<8x8xf32>
    %cst_22 = arith.constant dense<0.000000e+00> : vector<8x8xf32>
    %61 = tpu.matmul %59, %60, %cst_22 {dimension_numbers = #tpu.dot_dimension_numbers<[1], [0], [0], [1], [0, 0, 1, 1], [], []>} : vector<8x8xf32>, vector<8x8xf32>, vector<8x8xf32> -> vector<8x8xf32>
    %62 = vector.extract_strided_slice %2 {offsets = [0, 24], sizes = [8, 8], strides = [1, 1]} : vector<8x32xf32> to vector<8x8xf32>
    %63 = vector.extract_strided_slice %3 {offsets = [0, 24], sizes = [8, 8], strides = [1, 1]} : vector<8x32xf32> to vector<8x8xf32>
    %64 = tpu.transpose %63, [1, 0] : vector<8x8xf32> -> vector<8x8xf32>
    %cst_23 = arith.constant dense<0.000000e+00> : vector<8x8xf32>
    %65 = tpu.matmul %62, %64, %cst_23 {dimension_numbers = #tpu.dot_dimension_numbers<[1], [0], [0], [1], [0, 0, 1, 1], [], []>} : vector<8x8xf32>, vector<8x8xf32>, vector<8x8xf32> -> vector<8x8xf32>
    %c0_24 = arith.constant 0 : index
    %c3 = arith.constant 3 : index
    %c0_25 = arith.constant 0 : index
    %c0_26 = arith.constant 0 : index
    %66 = vector.load %arg2[%c0_24, %c3, %c0_25, %c0_26] : memref<1x4x8x8xf32, #tpu.memory_space<vmem>>, vector<1x1x8x8xf32>
    %67 = vector.shape_cast %66 : vector<1x1x8x8xf32> to vector<8x8xf32>
    %68 = arith.addf %65, %67 : vector<8x8xf32>
    %cst_27 = arith.constant dense<0xFF800000> : vector<8xf32>
    %69 = vector.multi_reduction <maximumf>, %68, %cst_27 [1] : vector<8x8xf32> to vector<8xf32>
    %70 = vector.shape_cast %69 : vector<8xf32> to vector<8x1xf32>
    %71 = vector.broadcast %70 : vector<8x1xf32> to vector<8x8xf32>
    %72 = arith.subf %68, %71 : vector<8x8xf32>
    %73 = math.exp %72 : vector<8x8xf32>
    %cst_28 = arith.constant dense<0.000000e+00> : vector<8xf32>
    %74 = vector.multi_reduction <add>, %73, %cst_28 [1] : vector<8x8xf32> to vector<8xf32>
    %75 = vector.shape_cast %74 : vector<8xf32> to vector<8x1xf32>
    %76 = tpu.reciprocal %75 {approx = true} : vector<8x1xf32> -> vector<8x1xf32>
    %77 = vector.broadcast %76 : vector<8x1xf32> to vector<8x8xf32>
    %78 = arith.mulf %73, %77 : vector<8x8xf32>
    %79 = vector.extract_strided_slice %4 {offsets = [0, 24], sizes = [8, 8], strides = [1, 1]} : vector<8x32xf32> to vector<8x8xf32>
    %cst_29 = arith.constant dense<0.000000e+00> : vector<8x8xf32>
    %80 = tpu.matmul %78, %79, %cst_29 {dimension_numbers = #tpu.dot_dimension_numbers<[1], [0], [0], [1], [0, 0, 1, 1], [], []>} : vector<8x8xf32>, vector<8x8xf32>, vector<8x8xf32> -> vector<8x8xf32>
    %81 = tpu.concatenate %23, %42, %61, %80 in 1 : vector<8x8xf32>, vector<8x8xf32>, vector<8x8xf32>, vector<8x8xf32> -> vector<8x32xf32>
    %c0_30 = arith.constant 0 : index
    %c0_31 = arith.constant 0 : index
    %c0_32 = arith.constant 0 : index
    %82 = vector.load %arg3[%c0_30, %c0_31, %c0_32] : memref<1x8x32xf32, #tpu.memory_space<vmem>>, vector<1x8x32xf32>
    %83 = vector.shape_cast %82 : vector<1x8x32xf32> to vector<8x32xf32>
    %84 = vector.shape_cast %81 : vector<8x32xf32> to vector<1x8x32xf32>
    tpu.vector_store %arg3[%c0_30, %c0_31, %c0_32], %84 {strides = array<i32>} : memref<1x8x32xf32, #tpu.memory_space<vmem>>, vector<1x8x32xf32>,
    return
  }
  func.func @transform_0(%arg0: i32) -> (i32, i32, i32) {
    %c0_i32 = arith.constant 0 : i32
    %c0_i32_0 = arith.constant 0 : i32
    %c0_i32_1 = arith.constant 0 : i32
    return %arg0, %c0_i32, %c0_i32_0 : i32, i32, i32
  }
  func.func @transform_1(%arg0: i32) -> (i32, i32, i32, i32) {
    %c0_i32 = arith.constant 0 : i32
    %c0_i32_0 = arith.constant 0 : i32
    %c0_i32_1 = arith.constant 0 : i32
    %c0_i32_2 = arith.constant 0 : i32
    return %arg0, %c0_i32, %c0_i32_0, %c0_i32_1 : i32, i32, i32, i32
  }
  func.func @transform_2(%arg0: i32) -> (i32, i32, i32) {
    %c0_i32 = arith.constant 0 : i32
    %c0_i32_0 = arith.constant 0 : i32
    %c0_i32_1 = arith.constant 0 : i32
    return %arg0, %c0_i32, %c0_i32_0 : i32, i32, i32
  }
}

module attributes {stable_mosaic.version = 11 : i64} {
  func.func @_ffn_add_ln_kernel(%arg0: i32, %arg1: memref<16x32xf32, #tpu.memory_space<vmem>>, %arg2: memref<32x64xf32, #tpu.memory_space<vmem>>, %arg3: memref<1x64xf32, #tpu.memory_space<vmem>>, %arg4: memref<64x32xf32, #tpu.memory_space<vmem>>, %arg5: memref<1x32xf32, #tpu.memory_space<vmem>>, %arg6: memref<1x32xf32, #tpu.memory_space<vmem>>, %arg7: memref<1x32xf32, #tpu.memory_space<vmem>>, %arg8: memref<16x32xf32, #tpu.memory_space<vmem>>) attributes {dimension_semantics = [#tpu.dimension_semantics<parallel>], iteration_bounds = array<i64: 1>, scalar_prefetch = 0 : i64, scratch_operands = 0 : i64, tpu.core_type = #tpu.core_type<tc>, window_params = [{transform_indices = @transform_0, window_bounds = array<i64: 16, 32>}, {pipeline_mode = #tpu.pipeline_mode<synchronous>, transform_indices = @transform_1, window_bounds = array<i64: 32, 64>}, {pipeline_mode = #tpu.pipeline_mode<synchronous>, transform_indices = @transform_2, window_bounds = array<i64: 1, 64>}, {pipeline_mode = #tpu.pipeline_mode<synchronous>, transform_indices = @transform_3, window_bounds = array<i64: 64, 32>}, {pipeline_mode = #tpu.pipeline_mode<synchronous>, transform_indices = @transform_4, window_bounds = array<i64: 1, 32>}, {pipeline_mode = #tpu.pipeline_mode<synchronous>, transform_indices = @transform_5, window_bounds = array<i64: 1, 32>}, {pipeline_mode = #tpu.pipeline_mode<synchronous>, transform_indices = @transform_6, window_bounds = array<i64: 1, 32>}, {transform_indices = @transform_7, window_bounds = array<i64: 16, 32>}]} {
    %c0 = arith.constant 0 : index
    %c0_0 = arith.constant 0 : index
    %0 = vector.load %arg1[%c0, %c0_0] : memref<16x32xf32, #tpu.memory_space<vmem>>, vector<16x32xf32>
    %c0_1 = arith.constant 0 : index
    %c0_2 = arith.constant 0 : index
    %1 = vector.load %arg2[%c0_1, %c0_2] : memref<32x64xf32, #tpu.memory_space<vmem>>, vector<32x64xf32>
    %cst = arith.constant dense<0.000000e+00> : vector<16x64xf32>
    %2 = tpu.matmul %0, %1, %cst {dimension_numbers = #tpu.dot_dimension_numbers<[1], [0], [0], [1], [0, 0, 1, 1], [], []>} : vector<16x32xf32>, vector<32x64xf32>, vector<16x64xf32> -> vector<16x64xf32>
    %c0_3 = arith.constant 0 : index
    %c0_4 = arith.constant 0 : index
    %3 = vector.load %arg3[%c0_3, %c0_4] : memref<1x64xf32, #tpu.memory_space<vmem>>, vector<1x64xf32>
    %4 = vector.broadcast %3 : vector<1x64xf32> to vector<16x64xf32>
    %5 = arith.addf %2, %4 : vector<16x64xf32>
    %cst_5 = arith.constant 0.000000e+00 : f32
    %6 = vector.broadcast %cst_5 : f32 to vector<16x64xf32>
    %7 = arith.maximumf %5, %6 : vector<16x64xf32>
    %c0_6 = arith.constant 0 : index
    %c0_7 = arith.constant 0 : index
    %8 = vector.load %arg4[%c0_6, %c0_7] : memref<64x32xf32, #tpu.memory_space<vmem>>, vector<64x32xf32>
    %cst_8 = arith.constant dense<0.000000e+00> : vector<16x32xf32>
    %9 = tpu.matmul %7, %8, %cst_8 {dimension_numbers = #tpu.dot_dimension_numbers<[1], [0], [0], [1], [0, 0, 1, 1], [], []>} : vector<16x64xf32>, vector<64x32xf32>, vector<16x32xf32> -> vector<16x32xf32>
    %c0_9 = arith.constant 0 : index
    %c0_10 = arith.constant 0 : index
    %10 = vector.load %arg5[%c0_9, %c0_10] : memref<1x32xf32, #tpu.memory_space<vmem>>, vector<1x32xf32>
    %11 = vector.broadcast %10 : vector<1x32xf32> to vector<16x32xf32>
    %12 = arith.addf %9, %11 : vector<16x32xf32>
    %13 = arith.addf %12, %0 : vector<16x32xf32>
    %cst_11 = arith.constant dense<0.000000e+00> : vector<16xf32>
    %14 = vector.multi_reduction <add>, %13, %cst_11 [1] : vector<16x32xf32> to vector<16xf32>
    %15 = vector.shape_cast %14 : vector<16xf32> to vector<16x1xf32>
    %cst_12 = arith.constant 3.200000e+01 : f32
    %16 = vector.broadcast %cst_12 : f32 to vector<16x1xf32>
    %17 = arith.divf %15, %16 : vector<16x1xf32>
    %18 = vector.broadcast %17 : vector<16x1xf32> to vector<16x32xf32>
    %19 = arith.subf %13, %18 : vector<16x32xf32>
    %20 = vector.broadcast %17 : vector<16x1xf32> to vector<16x32xf32>
    %21 = arith.subf %13, %20 : vector<16x32xf32>
    %22 = arith.mulf %19, %21 : vector<16x32xf32>
    %cst_13 = arith.constant dense<0.000000e+00> : vector<16xf32>
    %23 = vector.multi_reduction <add>, %22, %cst_13 [1] : vector<16x32xf32> to vector<16xf32>
    %24 = vector.shape_cast %23 : vector<16xf32> to vector<16x1xf32>
    %cst_14 = arith.constant 3.200000e+01 : f32
    %25 = vector.broadcast %cst_14 : f32 to vector<16x1xf32>
    %26 = arith.divf %24, %25 : vector<16x1xf32>
    %27 = vector.broadcast %17 : vector<16x1xf32> to vector<16x32xf32>
    %28 = arith.subf %13, %27 : vector<16x32xf32>
    %cst_15 = arith.constant 9.99999974E-6 : f32
    %29 = vector.broadcast %cst_15 : f32 to vector<16x1xf32>
    %30 = arith.addf %26, %29 : vector<16x1xf32>
    %31 = math.rsqrt %30 : vector<16x1xf32>
    %32 = vector.broadcast %31 : vector<16x1xf32> to vector<16x32xf32>
    %33 = arith.mulf %28, %32 : vector<16x32xf32>
    %c0_16 = arith.constant 0 : index
    %c0_17 = arith.constant 0 : index
    %34 = vector.load %arg6[%c0_16, %c0_17] : memref<1x32xf32, #tpu.memory_space<vmem>>, vector<1x32xf32>
    %35 = vector.broadcast %34 : vector<1x32xf32> to vector<16x32xf32>
    %36 = arith.mulf %33, %35 : vector<16x32xf32>
    %c0_18 = arith.constant 0 : index
    %c0_19 = arith.constant 0 : index
    %37 = vector.load %arg7[%c0_18, %c0_19] : memref<1x32xf32, #tpu.memory_space<vmem>>, vector<1x32xf32>
    %38 = vector.broadcast %37 : vector<1x32xf32> to vector<16x32xf32>
    %39 = arith.addf %36, %38 : vector<16x32xf32>
    %c0_20 = arith.constant 0 : index
    %c0_21 = arith.constant 0 : index
    %40 = vector.load %arg8[%c0_20, %c0_21] : memref<16x32xf32, #tpu.memory_space<vmem>>, vector<16x32xf32>
    tpu.vector_store %arg8[%c0_20, %c0_21], %39 {strides = array<i32>} : memref<16x32xf32, #tpu.memory_space<vmem>>, vector<16x32xf32>,
    return
  }
  func.func @transform_0(%arg0: i32) -> (i32, i32) {
    %c0_i32 = arith.constant 0 : i32
    %c0_i32_0 = arith.constant 0 : i32
    return %arg0, %c0_i32 : i32, i32
  }
  func.func @transform_1(%arg0: i32) -> (i32, i32) {
    %c0_i32 = arith.constant 0 : i32
    %c0_i32_0 = arith.constant 0 : i32
    %c0_i32_1 = arith.constant 0 : i32
    return %c0_i32, %c0_i32_0 : i32, i32
  }
  func.func @transform_2(%arg0: i32) -> (i32, i32) {
    %c0_i32 = arith.constant 0 : i32
    %c0_i32_0 = arith.constant 0 : i32
    %c0_i32_1 = arith.constant 0 : i32
    return %c0_i32, %c0_i32_0 : i32, i32
  }
  func.func @transform_3(%arg0: i32) -> (i32, i32) {
    %c0_i32 = arith.constant 0 : i32
    %c0_i32_0 = arith.constant 0 : i32
    %c0_i32_1 = arith.constant 0 : i32
    return %c0_i32, %c0_i32_0 : i32, i32
  }
  func.func @transform_4(%arg0: i32) -> (i32, i32) {
    %c0_i32 = arith.constant 0 : i32
    %c0_i32_0 = arith.constant 0 : i32
    %c0_i32_1 = arith.constant 0 : i32
    return %c0_i32, %c0_i32_0 : i32, i32
  }
  func.func @transform_5(%arg0: i32) -> (i32, i32) {
    %c0_i32 = arith.constant 0 : i32
    %c0_i32_0 = arith.constant 0 : i32
    %c0_i32_1 = arith.constant 0 : i32
    return %c0_i32, %c0_i32_0 : i32, i32
  }
  func.func @transform_6(%arg0: i32) -> (i32, i32) {
    %c0_i32 = arith.constant 0 : i32
    %c0_i32_0 = arith.constant 0 : i32
    %c0_i32_1 = arith.constant 0 : i32
    return %c0_i32, %c0_i32_0 : i32, i32
  }
  func.func @transform_7(%arg0: i32) -> (i32, i32) {
    %c0_i32 = arith.constant 0 : i32
    %c0_i32_0 = arith.constant 0 : i32
    return %arg0, %c0_i32 : i32, i32
  }
}

</mosaic_0001>

<bundles_post_ra>
// kernel: transformer_m_encoder_layer.4
= control target key start
LH: loop header
LB: loop body
LE: loop exit
PB: predicated region body
PF: predicated region fallthrough
CT: control target
= control target key end

     0   :  { %vm27_vm0 = vcmask 261120   ;;  %vm109_vm1 = vcmask 785408   ;;  %s191_s1 = inlined_call_operand.vmem [shape: f32[32,96], index: 1, kind: input, shape index: {}]   ;;  %s192_s0 = inlined_call_operand.vmem [shape: f32[16,32], index: 0, kind: input, shape index: {}]   ;;  %s193_s2 = inlined_call_operand.vmem [shape: f32[1,96], index: 2, kind: input, shape index: {}]   ;;  %s194_s3 = inlined_call_operand.vmem [shape: f32[16,96], index: 3, kind: output, shape index: {}]  }
   0x1   :  { %v16_v0 = vld [vmem:[%s191_s1] sm:$0xff]  ;;  %v17_v1 = vld [vmem:[%s191_s1 + $0x8] sm:$0xff]  ;;  %v18_v2 = vld [vmem:[%s191_s1 + $0x10] sm:$0xff] }
   0x2   :  { %v136_v3 = vpack.c.bf16 %v17_v1, %v16_v0  ;;  %v19_v4 = vld [vmem:[%s191_s1 + $0x18] sm:$0xff]  ;;  %v14_v5 = vld [vmem:[%s192_s0] sm:$0xff]  ;;  %v15_v7 = vld [vmem:[%s192_s0 + $0x8] sm:$0xff] }
   0x3   :  { %v140_v6 = vpack.c.bf16 %v19_v4, %v18_v2  ;;  %133 = vmatprep.mubr.msk.f32.mxu0 %vm27_vm0, %v14_v5  ;;  %v116_v8 = vld [vmem:[%s193_s2] ss:$0 sm:$0xff] }
   0x4   :  { %137 = vmatprep.subr.bf16.mxu0 %v136_v3 }
   0x5   :  { %139 = vmatpush3.bf16.msra.mxu0 %v136_v3 }
   0x6   :  { %141 = vmatprep.subr.bf16.mxu0 %v140_v6 }
   0x9   :  { %143 = vmatpush3.bf16.msra.mxu0 %v140_v6 }
   0xc   :  { %134 = vmatmul.mubr.msk.f32.vlgmr.msra.gmra.mrb[0].mxu0 %vm27_vm0, %v15_v7 }
  0xdf   :  { %v135_v9 = vpop.f32.mrb[0].mxu0 }
  0xe0   :  { %v106_v10 = vadd.f32 %v135_v9, %v116_v8  ;;  %v100_v11 = vpop.f32.mrb[1].mxu0 }
  0xe1   :  { %v101_v12 = vadd.f32 %v116_v8, %v100_v11 }
  0xe2   :  { %111 = vst.msk [vmem:[%s194_s3 + $0x8] sm:$0xff] %vm109_vm1, %v106_v10 }
  0xe3   :  { %110 = vst.msk [vmem:[%s194_s3] sm:$0xff] %vm109_vm1, %v101_v12 }

// kernel: transformer_m_encoder_layer.6
= control target key start
LH: loop header
LB: loop body
LE: loop exit
PB: predicated region body
PF: predicated region fallthrough
CT: control target
= control target key end

     0   :  { %vm36_vm0 = vcmask 261120   ;;  %s289_s1 = inlined_call_operand.vmem [shape: f32[32,32], index: 1, kind: input, shape index: {}]   ;;  %s290_s0 = inlined_call_operand.vmem [shape: f32[16,32], index: 0, kind: input, shape index: {}]   ;;  %s291_s2 = inlined_call_operand.vmem [shape: f32[1,32], index: 2, kind: input, shape index: {}]   ;;  %s292_s3 = inlined_call_operand.vmem [shape: f32[16,32], index: 3, kind: input, shape index: {}]   ;;  %s293_s4 = inlined_call_operand.vmem [shape: f32[1,32], index: 4, kind: input, shape index: {}]   ;;  %s294_s5 = inlined_call_operand.vmem [shape: f32[1,32], index: 5, kind: input, shape index: {}]   ;;  %s295_s6 = inlined_call_operand.vmem [shape: f32[16,32], index: 6, kind: output, shape index: {}]  }
   0x1   :  { %v25_v0 = vld [vmem:[%s289_s1] sm:$0xff]  ;;  %v26_v1 = vld [vmem:[%s289_s1 + $0x8] sm:$0xff]  ;;  %v27_v2 = vld [vmem:[%s289_s1 + $0x10] sm:$0xff] }
   0x2   :  { %v195_v3 = vpack.c.bf16 %v26_v1, %v25_v0  ;;  %v28_v4 = vld [vmem:[%s289_s1 + $0x18] sm:$0xff]  ;;  %v23_v5 = vld [vmem:[%s290_s0] sm:$0xff]  ;;  %v24_v7 = vld [vmem:[%s290_s0 + $0x8] sm:$0xff] }
   0x3   :  { %v199_v6 = vpack.c.bf16 %v28_v4, %v27_v2  ;;  %192 = vmatprep.mubr.msk.f32.mxu0 %vm36_vm0, %v23_v5  ;;  %v173_v8 = vld [vmem:[%s291_s2] ss:$0 sm:$0xff]  ;;  %v119_v14 = vld [vmem:[%s292_s3 + $0x8] sm:$0xff] }
   0x4   :  { %196 = vmatprep.subr.bf16.mxu0 %v195_v3  ;;  %v118_v11 = vld [vmem:[%s292_s3] sm:$0xff] }
   0x5   :  { %198 = vmatpush3.bf16.msra.mxu0 %v195_v3  ;;  %v176_v36 = vld [vmem:[%s293_s4] ss:$0 sm:$0xff] }
   0x6   :  { %200 = vmatprep.subr.bf16.mxu0 %v199_v6  ;;  %v177_v38 = vld [vmem:[%s294_s5] ss:$0 sm:$0xff] }
   0x9   :  { %202 = vmatpush3.bf16.msra.mxu0 %v199_v6 }
   0xc   :  { %193 = vmatmul.mubr.msk.f32.vlgmr.msra.gmra.mrb[0].mxu0 %vm36_vm0, %v24_v7 }
  0xdf   :  { %v194_v9 = vpop.f32.mrb[0].mxu0 }
  0xe0   :  { %v109_v10 = vpop.f32.mrb[1].mxu0  ;;  %v115_v12 = vadd.f32 %v194_v9, %v173_v8 }
  0xe1   :  { %v110_v13 = vadd.f32 %v173_v8, %v109_v10 }
  0xe2   :  { %v121_v17 = vadd.f32 %v119_v14, %v115_v12 }
  0xe3   :  { %v120_v15 = vadd.f32 %v118_v11, %v110_v13 }
  0xe4   :  { %v125_v18 = vsel %vm36_vm0, %v121_v17, 0.0 }
  0xe5   :  { %v122_v16 = vsel %vm36_vm0, %v120_v15, 0.0 }
  0xe6   :  { %123 = vadd.xlane.f32.xlu0 %v122_v16 }
  0xea   :  { %126 = vadd.xlane.f32.xlu0 %v125_v18 }
 0x173   :  { %v124_v19 = vpop.xlane.xlu0 %123 }
 0x174   :  { %v129_v20 = vmul.f32 0.03125, %v124_v19 }
 0x176   :  { %v131_v21 = vsub.f32 %v120_v15, %v129_v20 }
 0x177   :  { %v127_v22 = vpop.xlane.xlu0 %126 }
 0x178   :  { %v130_v23 = vmul.f32 0.03125, %v127_v22  ;;  %v133_v24 = vmul.f32 %v131_v21, %v131_v21 }
 0x17a   :  { %v132_v25 = vsub.f32 %v121_v17, %v130_v23  ;;  %v135_v26 = vsel %vm36_vm0, %v133_v24, 0.0 }
 0x17b   :  { %136 = vadd.xlane.f32.xlu1 %v135_v26 }
 0x17c   :  { %v134_v27 = vmul.f32 %v132_v25, %v132_v25 }
 0x17e   :  { %v138_v28 = vsel %vm36_vm0, %v134_v27, 0.0 }
 0x17f   :  { %139 = vadd.xlane.f32.xlu1 %v138_v28 }
 0x208   :  { %v137_v29 = vpop.xlane.xlu1 %136 }
 0x209   :  { %v141_v30 = vmul.f32 0.03125, %v137_v29 }
 0x20b   :  { %v143_v31 = vadd.f32 1e-05, %v141_v30 }
 0x20c   :  { %v140_v32 = vpop.xlane.xlu1 %139 }
 0x20d   :  { %203 = vrsqrt.f32 %v143_v31  ;;  %v142_v33 = vmul.f32 0.03125, %v140_v32 }
 0x20f   :  { %v144_v34 = vadd.f32 1e-05, %v142_v33 }
 0x211   :  { %205 = vrsqrt.f32 %v144_v34 }
 0x217   :  { %v204_v35 = vpop.eup %203 }
 0x218   :  { %v147_v37 = vmul.f32 %v204_v35, %v131_v21 }
 0x21a   :  { %v156_v39 = vmul.f32 %v176_v36, %v147_v37 }
 0x21b   :  { %v206_v40 = vpop.eup %205 }
 0x21c   :  { %v165_v41 = vadd.f32 %v177_v38, %v156_v39  ;;  %v148_v42 = vmul.f32 %v206_v40, %v132_v25 }
 0x21e   :  { %167 = vst.msk [vmem:[%s295_s6] sm:$0xff] %vm36_vm0, %v165_v41  ;;  %v157_v43 = vmul.f32 %v176_v36, %v148_v42 }
 0x220   :  { %v166_v44 = vadd.f32 %v177_v38, %v157_v43 }
 0x222   :  { %168 = vst.msk [vmem:[%s295_s6 + $0x8] sm:$0xff] %vm36_vm0, %v166_v44 }

// kernel: transformer_m_encoder_layer.5
= control target key start
LH: loop header
LB: loop body
LE: loop exit
PB: predicated region body
PF: predicated region fallthrough
CT: control target
= control target key end

     0   :  { %s1073_s9 = smov 0   ;;  %s1169_s0 = inlined_call_operand.vmem [shape: f32[2,8,96], index: 0, kind: input, shape index: {}]   ;;  %s1170_s1 = inlined_call_operand.vmem [shape: f32[2,4,8,8], index: 1, kind: input, shape index: {}]   ;;  %s1171_s2 = inlined_call_operand.vmem [shape: f32[2,8,32], index: 2, kind: output, shape index: {}]  }
   0x1 LB: > { %s911_s10 = sadd.s32 4294967295, %s1040_s9   ;;  %p915_p0 = scmp.ge.s32.totalorder %s1040_s9, 1  ;;  %s1040_s9 = sphi %s1073_s9, %s12_s9  }
   0x2   : > { %p121_p1 = scmp.lt.s32.totalorder %s1040_s9, 3 }
   0x4   : > { %p122_p2 = pnand %p915_p0, %p121_p1 }
   0x5   : > { %p146_p3 = scmp.lt.s32.totalorder (!%p122_p2), %s911_s10, 1  ;;  %v1042_v0 = vmov (!%p122_p2), 0.0   ;;  %vm1043_vm0 = vmmov (!%p122_p2), 0   ;;  %s1044_s15 = smov (!%p122_p2), 96   ;;  %vm164_vm1 = vcmask (!%p122_p2), 64512   ;;  %vm840_vm2 = vcmask (!%p122_p2), 130048  }
   0x6   : > { %125 = sbr.rel (%p122_p2) target bundleno = 1532 (0x5fc), region = 28  ;;  %954 = vmatprep.subr.mxu0 (!%p122_p2), %v1042_v0  ;;  %956 = vmatprep.mubr.msk.f32.mxu0 (!%p122_p2), %vm1043_vm0, %v1042_v0  ;;  %s1045_s16 = smov (!%p122_p2), 64   ;;  %vm842_vm3 = vcmask (!%p122_p2), 195584   ;;  %vm844_vm4 = vcmask (!%p122_p2), 261120  }
   0x7   : > { %959 = vmatprep.subr.mxu1 (!%p122_p2), %v1042_v0  ;;  %961 = vmatprep.mubr.msk.f32.mxu1 (!%p122_p2), %vm1043_vm0, %v1042_v0  ;;  %s1046_s17 = smov (!%p122_p2), 88   ;;  %s1047_s18 = smov (!%p122_p2), 120  }
   0x8   : > { %s1048_s19 = smov (!%p122_p2), 80   ;;  %s1049_s24 = smov (!%p122_p2), 72  }
   0x9   : > { %s1050_s25 = smov (!%p122_p2), 112   ;;  %s1051_s26 = smov (!%p122_p2), 104  }
   0xa   : > { %s1052_s27 = smov (!%p122_p2), 56   ;;  %s1053_s28 = smov (!%p122_p2), 40  }
   0xb   : > { %s1054_s29 = smov (!%p122_p2), 48   ;;  %s1055_s30 = smov (!%p122_p2), 8  }
   0xc   : > { %s1056_s3 = smov (!%p122_p2), 16   ;;  %s1057_s4 = smov (!%p122_p2), 24  }
   0xd   : > { %s1173_s10 = smov (!%p146_p3, %s911_s10), 1 }
   0xe   : > { %s916_s11 = sshll.u32 %s1173_s10, 3  ;;  %s937_s20 = sshll.u32 %s1173_s10, 5 }
   0xf   : > { %s149_s14 = scalar_lea.vmem %s1169_s0, %s916_s11  ;;  %s1112_s23 = scalar_lea.vmem %s1170_s1, %s937_s20 }
  0x10   : > { %v1095_v1 = vld [vmem:[%s149_s14] sm:$0xff]  ;;  %v923_v25 = vld [vmem:[%s1112_s23 + $0x8] sm:$0xff]  ;;  %v927_v29 = vld [vmem:[%s1112_s23 + $0x10] sm:$0xff]  ;;  %s158_s7 = scalar_lea.vmem %s1171_s2, %s916_s11 }
  0x11   : > { %162 = vrot.lane.b32.xlu0 %v1095_v1, %s1044_s15  ;;  %250 = vrot.lane.b32.xlu1 %v1095_v1, %s1045_s16  ;;  %v160_v3 = vld [vmem:[%s1112_s23] sm:$0xff]  ;;  %v931_v34 = vld [vmem:[%s1112_s23 + $0x18] sm:$0xff] }
  0x15   : > { %330 = vrot.lane.b32.xlu1 %v1095_v1, %s1046_s17 }
  0x19   : > { %328 = vrot.lane.b32.xlu1 %v1095_v1, %s1047_s18 }
  0x1d   : > { %497 = vrot.lane.b32.xlu1 %v1095_v1, %s1048_s19 }
  0x83   : > { %v163_v2 = vpop.permute.xlu0 %162  ;;  %v251_v8 = vpop.permute.xlu1 %250 }
  0x84   : > { %955 = vmatpush3.xpose.msk.msra.mxu0 %vm164_vm1, %v163_v2  ;;  %960 = vmatpush3.msra.mxu1 %v251_v8 }
  0x85   : > { %969 = vmatprep.subr.mxu0 %v1042_v0  ;;  %964 = vmatprep.subr.mxu1 %v1042_v0 }
  0x87   : > { %957 = vmatmul.mubr.msk.f32.vlgmr.msra.gmra.mrb[0].mxu0 %vm164_vm1, %v1095_v1  ;;  %v331_v14 = vpop.permute.xlu1 %330 }
  0x88   : > { %971 = vmatprep.mubr.msk.f32.mxu0 %vm1043_vm0, %v1042_v0 }
  0x8b   : > { %v329_v15 = vpop.permute.xlu1 %328 }
  0x8f   : > { %v498_v16 = vpop.permute.xlu1 %497 }
 0x15a   : > { %v235_v4 = vpop.f32.mrb[0].mxu0 }
 0x15b   : > { %v236_v5 = vadd.f32 %v235_v4, %v160_v3  ;;  %v958_v6 = vpop.f32.mrb[1].mxu0 }
 0x15d   : > { %v239_v7 = vsel %vm164_vm1, %v236_v5, -inf }
 0x15e   : > { %240 = vmax.xlane.f32.xlu0 %v239_v7 }
 0x174   : > { %664 = vrot.lane.b32.xlu0 %v1095_v1, %s1049_s24 }
 0x1eb   : > { %v241_v9 = vpop.xlane.xlu0 %240 }
 0x1ec   : > { %v242_v10 = vsub.f32 %v236_v5, %v241_v9 }
 0x1ee   : > { %v243_v11 = vmul.f32 1.442695, %v242_v10 }
 0x1ef   : > { %v665_v21 = vpop.permute.xlu0 %664 }
 0x1f0   : > { %1018 = vpow2.f32 %v243_v11 }
 0x1fa   : > { %v1019_v12 = vpop.eup %1018 }
 0x1fb   : > { %v245_v13 = vsel %vm164_vm1, %v1019_v12, 0.0 }
 0x1fc   : > { %246 = vadd.xlane.f32.xlu1 %v245_v13 }
 0x20d   : > { %495 = vrot.lane.b32.xlu1 %v1095_v1, %s1050_s25 }
 0x211   : > { %662 = vrot.lane.b32.xlu1 %v1095_v1, %s1051_s26 }
 0x289   : > { %v247_v17 = vpop.xlane.xlu1 %246 }
 0x28a   : > { %1020 = vrcp.f32 %v247_v17 }
 0x28d   : > { %v496_v20 = vpop.permute.xlu1 %495 }
 0x291   : > { %v663_v22 = vpop.permute.xlu1 %662 }
 0x294   : > { %v1021_v18 = vpop.eup %1020 }
 0x295   : > { %v249_v19 = vmul.f32 %v1021_v18, %v1019_v12 }
 0x297   : > { %962 = vmatmul.mubr.msk.f32.vlgmr.msra.gmra.mrb[0].mxu1 %vm164_vm1, %v249_v19 }
 0x298   : > { %965 = vmatpush3.xpose.msk.msra.mxu1 %vm164_vm1, %v331_v14  ;;  %966 = vmatprep.mubr.msk.f32.mxu1 %vm1043_vm0, %v1042_v0 }
 0x299   : > { %974 = vmatprep.subr.mxu1 %v1042_v0 }
 0x29b   : > { %967 = vmatmul.mubr.msk.f32.vlgmr.msra.gmra.mrb[2].mxu1 %vm164_vm1, %v329_v15 }
 0x29c   : > { %975 = vmatpush3.xpose.msk.msra.mxu1 %vm164_vm1, %v498_v16  ;;  %976 = vmatprep.mubr.msk.f32.mxu1 %vm1043_vm0, %v1042_v0 }
 0x29d   : > { %984 = vmatprep.subr.mxu1 %v1042_v0 }
 0x29f   : > { %977 = vmatmul.mubr.msk.f32.vlgmr.msra.gmra.mrb[4].mxu1 %vm164_vm1, %v496_v20 }
 0x2a0   : > { %985 = vmatpush3.xpose.msk.msra.mxu1 %vm164_vm1, %v665_v21  ;;  %986 = vmatprep.mubr.msk.f32.mxu1 %vm1043_vm0, %v1042_v0 }
 0x2a3   : > { %987 = vmatmul.mubr.msk.f32.vlgmr.msra.gmra.mrb[6].mxu1 %vm164_vm1, %v663_v22 }
 0x36a   : > { %v1136_v23 = vpop.f32.mrb[0].mxu1 }
 0x36b   : > { %v963_v24 = vpop.f32.mrb[1].mxu1 }
 0x36e   : > { %v402_v26 = vpop.f32.mrb[2].mxu1 }
 0x36f   : > { %v403_v27 = vadd.f32 %v923_v25, %v402_v26  ;;  %v968_v28 = vpop.f32.mrb[3].mxu1 }
 0x371   : > { %v406_v30 = vsel %vm164_vm1, %v403_v27, -inf }
 0x372   : > { %407 = vmax.xlane.f32.xlu1 %v406_v30  ;;  %v569_v31 = vpop.f32.mrb[4].mxu1 }
 0x373   : > { %v570_v32 = vadd.f32 %v927_v29, %v569_v31  ;;  %v978_v33 = vpop.f32.mrb[5].mxu1 }
 0x375   : > { %v573_v35 = vsel %vm164_vm1, %v570_v32, -inf }
 0x376   : > { %574 = vmax.xlane.f32.xlu0 %v573_v35  ;;  %v736_v36 = vpop.f32.mrb[6].mxu1 }
 0x377   : > { %v737_v37 = vadd.f32 %v931_v34, %v736_v36  ;;  %v988_v38 = vpop.f32.mrb[7].mxu1 }
 0x379   : > { %v740_v39 = vsel %vm164_vm1, %v737_v37, -inf }
 0x37a   : > { %741 = vmax.xlane.f32.xlu1 %v740_v39 }
 0x38b   : > { %417 = vrot.lane.b32.xlu1 %v1095_v1, %s1052_s27 }
 0x3ff   : > { %v408_v40 = vpop.xlane.xlu1 %407 }
 0x400   : > { %v409_v41 = vsub.f32 %v403_v27, %v408_v40 }
 0x402   : > { %v410_v42 = vmul.f32 1.442695, %v409_v41 }
 0x403   : > { %v575_v43 = vpop.xlane.xlu0 %574 }
 0x404   : > { %1022 = vpow2.f32 %v410_v42  ;;  %v576_v44 = vsub.f32 %v570_v32, %v575_v43 }
 0x406   : > { %v577_v45 = vmul.f32 1.442695, %v576_v44 }
 0x407   : > { %v742_v46 = vpop.xlane.xlu1 %741 }
 0x408   : > { %1024 = vpow2.f32 %v577_v45  ;;  %v743_v47 = vsub.f32 %v737_v37, %v742_v46 }
 0x40a   : > { %v744_v48 = vmul.f32 1.442695, %v743_v47 }
 0x40b   : > { %v418_v49 = vpop.permute.xlu1 %417 }
 0x40c   : > { %1026 = vpow2.f32 %v744_v48  ;;  %970 = vmatpush3.msra.mxu0 %v418_v49 }
 0x40d   : > { %979 = vmatprep.subr.mxu0 %v1042_v0 }
 0x40e   : > { %v1023_v50 = vpop.eup %1022 }
 0x40f   : > { %v412_v51 = vsel %vm164_vm1, %v1023_v50, 0.0 }
 0x410   : > { %413 = vadd.xlane.f32.xlu1 %v412_v51 }
 0x412   : > { %v1025_v52 = vpop.eup %1024 }
 0x413   : > { %v579_v53 = vsel %vm164_vm1, %v1025_v52, 0.0 }
 0x414   : > { %580 = vadd.xlane.f32.xlu1 %v579_v53 }
 0x416   : > { %v1027_v54 = vpop.eup %1026 }
 0x417   : > { %v746_v55 = vsel %vm164_vm1, %v1027_v54, 0.0 }
 0x418   : > { %747 = vadd.xlane.f32.xlu0 %v746_v55 }
 0x425   : > { %751 = vrot.lane.b32.xlu1 %v1095_v1, %s1053_s28 }
 0x42e   : > { %584 = vrot.lane.b32.xlu0 %v1095_v1, %s1054_s29 }
 0x49d   : > { %v414_v56 = vpop.xlane.xlu1 %413 }
 0x49e   : > { %1028 = vrcp.f32 %v414_v56 }
 0x4a1   : > { %v581_v57 = vpop.xlane.xlu1 %580 }
 0x4a2   : > { %1030 = vrcp.f32 %v581_v57 }
 0x4a5   : > { %v748_v58 = vpop.xlane.xlu0 %747  ;;  %v752_v2 = vpop.permute.xlu1 %751 }
 0x4a6   : > { %1032 = vrcp.f32 %v748_v58 }
 0x4a8   : > { %v1029_v59 = vpop.eup %1028 }
 0x4a9   : > { %v416_v60 = vmul.f32 %v1029_v59, %v1023_v50  ;;  %v585_v61 = vpop.permute.xlu0 %584 }
 0x4ab   : > { %972 = vmatmul.mubr.msk.f32.vlgmr.msra.gmra.mrb[2].mxu0 %vm164_vm1, %v416_v60 }
 0x4ac   : > { %v1031_v62 = vpop.eup %1030  ;;  %980 = vmatpush3.msra.mxu0 %v585_v61  ;;  %981 = vmatprep.mubr.msk.f32.mxu0 %vm1043_vm0, %v1042_v0 }
 0x4ad   : > { %v583_v63 = vmul.f32 %v1031_v62, %v1025_v52  ;;  %989 = vmatprep.subr.mxu0 %v1042_v0 }
 0x4af   : > { %982 = vmatmul.mubr.msk.f32.vlgmr.msra.gmra.mrb[4].mxu0 %vm164_vm1, %v583_v63 }
 0x4b0   : > { %v1033_v1 = vpop.eup %1032  ;;  %990 = vmatpush3.msra.mxu0 %v752_v2  ;;  %991 = vmatprep.mubr.msk.f32.mxu0 %vm1043_vm0, %v1042_v0 }
 0x4b1   : > { %v750_v3 = vmul.f32 %v1033_v1, %v1027_v54 }
 0x4b3   : > { %992 = vmatmul.mubr.msk.f32.vlgmr.msra.gmra.mrb[6].mxu0 %vm164_vm1, %v750_v3 }
 0x57e   : > { %v489_v4 = vpop.f32.mrb[2].mxu0 }
 0x57f   : > { %828 = vrot.lane.b32.xlu1 %v489_v4, %s1055_s30  ;;  %v973_v5 = vpop.f32.mrb[3].mxu0 }
 0x582   : > { %v656_v6 = vpop.f32.mrb[4].mxu0 }
 0x583   : > { %832 = vrot.lane.b32.xlu0 %v656_v6, %s1056_s3  ;;  %v983_v7 = vpop.f32.mrb[5].mxu0 }
 0x586   : > { %v823_v8 = vpop.f32.mrb[6].mxu0 }
 0x587   : > { %836 = vrot.lane.b32.xlu1 %v823_v8, %s1057_s4  ;;  %v993_v9 = vpop.f32.mrb[7].mxu0 }
 0x5f1   : > { %v829_v10 = vpop.permute.xlu1 %828 }
 0x5f2   : > { %v839_v0 = vsel %vm164_vm1, %v1136_v23, %v829_v10 }
 0x5f5   : > { %v833_v11 = vpop.permute.xlu0 %832 }
 0x5f6   : > { %v841_v12 = vsel %vm840_vm2, %v839_v0, %v833_v11 }
 0x5f9   : > { %v837_v13 = vpop.permute.xlu1 %836 }
 0x5fa   : > { %v843_v14 = vsel %vm842_vm3, %v841_v12, %v837_v13 }
 0x5fb   : > { %845 = vst.msk [vmem:[%s158_s7] sm:$0xff] %vm844_vm4, %v843_v14 }
 0x5fc PF: > { %s12_s9 = sadd.s32 1, %s1040_s9  }
 0x5fd   : > { %p9_p4 = scmp.ge.s32.totalorder %s12_s9, 4  }
 0x5ff   :  { %11 = sbr.rel (!%p9_p4) target bundleno = 1 (0x1), region = 64 }

// kernel: transformer_m_encoder_layer.7
= control target key start
LH: loop header
LB: loop body
LE: loop exit
PB: predicated region body
PF: predicated region fallthrough
CT: control target
= control target key end

     0   :  { %vm39_vm0 = vcmask 261120   ;;  %vm138_vm1 = vcmask 523264   ;;  %s463_s1 = inlined_call_operand.vmem [shape: f32[32,64], index: 1, kind: input, shape index: {}]   ;;  %s464_s0 = inlined_call_operand.vmem [shape: f32[16,32], index: 0, kind: input, shape index: {}]   ;;  %s465_s3 = inlined_call_operand.vmem [shape: f32[64,32], index: 3, kind: input, shape index: {}]   ;;  %s466_s2 = inlined_call_operand.vmem [shape: f32[1,64], index: 2, kind: input, shape index: {}]   ;;  %s467_s4 = inlined_call_operand.vmem [shape: f32[1,32], index: 4, kind: input, shape index: {}]   ;;  %s468_s5 = inlined_call_operand.vmem [shape: f32[1,32], index: 5, kind: input, shape index: {}]   ;;  %s469_s6 = inlined_call_operand.vmem [shape: f32[1,32], index: 6, kind: input, shape index: {}]   ;;  %s470_s7 = inlined_call_operand.vmem [shape: f32[16,32], index: 7, kind: output, shape index: {}]  }
   0x1   :  { %v28_v0 = vld [vmem:[%s463_s1] sm:$0xff]  ;;  %v29_v1 = vld [vmem:[%s463_s1 + $0x8] sm:$0xff]  ;;  %v30_v2 = vld [vmem:[%s463_s1 + $0x10] sm:$0xff] }
   0x2   :  { %v327_v3 = vpack.c.bf16 %v29_v1, %v28_v0  ;;  %v31_v4 = vld [vmem:[%s463_s1 + $0x18] sm:$0xff]  ;;  %v26_v5 = vld [vmem:[%s464_s0] sm:$0xff]  ;;  %v124_v8 = vld [vmem:[%s465_s3 + $0x8] sm:$0xff] }
   0x3   :  { %v331_v6 = vpack.c.bf16 %v31_v4, %v30_v2  ;;  %305 = vmatprep.mubr.msk.f32.mxu0 %vm39_vm0, %v26_v5  ;;  %v123_v7 = vld [vmem:[%s465_s3] sm:$0xff]  ;;  %v125_v9 = vld [vmem:[%s465_s3 + $0x10] sm:$0xff]  ;;  %v126_v11 = vld [vmem:[%s465_s3 + $0x18] sm:$0xff] }
   0x4   :  { %328 = vmatprep.subr.bf16.mxu0 %v327_v3  ;;  %v335_v10 = vpack.c.bf16 %v124_v8, %v123_v7  ;;  %v339_v12 = vpack.c.bf16 %v126_v11, %v125_v9  ;;  %v127_v13 = vld [vmem:[%s465_s3 + $0x20] sm:$0xff]  ;;  %v128_v14 = vld [vmem:[%s465_s3 + $0x28] sm:$0xff]  ;;  %v129_v17 = vld [vmem:[%s465_s3 + $0x30] sm:$0xff] }
   0x5   :  { %330 = vmatpush3.bf16.msra.mxu0 %v327_v3  ;;  %v343_v15 = vpack.c.bf16 %v128_v14, %v127_v13  ;;  %v27_v16 = vld [vmem:[%s464_s0 + $0x8] sm:$0xff]  ;;  %v130_v18 = vld [vmem:[%s465_s3 + $0x38] sm:$0xff]  ;;  %v273_v20 = vld [vmem:[%s466_s2] ss:$0 sm:$0xff] }
   0x6   :  { %332 = vmatprep.subr.bf16.mxu0 %v331_v6  ;;  %336 = vmatprep.subr.bf16.mxu1 %v335_v10  ;;  %v347_v19 = vpack.c.bf16 %v130_v18, %v129_v17  ;;  %v276_v27 = vld [vmem:[%s467_s4] ss:$0 sm:$0xff] }
   0x7   :  { %338 = vmatpush3.bf16.msra.mxu1 %v335_v10  ;;  %v279_v53 = vld [vmem:[%s468_s5] ss:$0 sm:$0xff] }
   0x8   :  { %340 = vmatprep.subr.bf16.mxu1 %v339_v12  ;;  %v280_v55 = vld [vmem:[%s469_s6] ss:$0 sm:$0xff] }
   0x9   :  { %334 = vmatpush3.bf16.msra.mxu0 %v331_v6 }
   0xb   :  { %342 = vmatpush3.bf16.msra.mxu1 %v339_v12 }
   0xc   :  { %306 = vmatmul.mubr.msk.f32.vlgmr.msra.gmra.mrb[0].mxu0 %vm39_vm0, %v27_v16  ;;  %344 = vmatprep.subr.bf16.mxu1 %v343_v15 }
   0xf   :  { %346 = vmatpush3.bf16.msra.mxu1 %v343_v15 }
  0x10   :  { %348 = vmatprep.subr.bf16.mxu1 %v347_v19 }
  0x13   :  { %350 = vmatpush3.bf16.msra.mxu1 %v347_v19 }
  0xdf   :  { %v307_v21 = vpop.f32.mrb[0].mxu0 }
  0xe0   :  { %v118_v22 = vadd.f32 %v307_v21, %v273_v20  ;;  %v112_v23 = vpop.f32.mrb[1].mxu0 }
  0xe1   :  { %v113_v24 = vadd.f32 %v273_v20, %v112_v23 }
  0xe2   :  { %v122_v26 = vmax.f32 %v118_v22, 0.0 }
  0xe3   :  { %v121_v25 = vmax.f32 %v113_v24, 0.0 }
  0xe5   :  { %324 = vmatprep.mubr.msk.f32.mxu1 %vm138_vm1, %v121_v25 }
  0xe6   :  { %325 = vmatmul.mubr.msk.f32.vlgmr.msra.gmra.mrb[0].mxu1 %vm138_vm1, %v122_v26 }
 0x1b9   :  { %v326_v28 = vpop.f32.mrb[0].mxu1 }
 0x1ba   :  { %v211_v29 = vpop.f32.mrb[1].mxu1  ;;  %v217_v30 = vadd.f32 %v326_v28, %v276_v27 }
 0x1bb   :  { %v212_v31 = vadd.f32 %v276_v27, %v211_v29 }
 0x1bc   :  { %v221_v34 = vadd.f32 %v217_v30, %v27_v16 }
 0x1bd   :  { %v220_v32 = vadd.f32 %v212_v31, %v26_v5 }
 0x1be   :  { %v225_v35 = vsel %vm39_vm0, %v221_v34, 0.0 }
 0x1bf   :  { %v222_v33 = vsel %vm39_vm0, %v220_v32, 0.0 }
 0x1c0   :  { %223 = vadd.xlane.f32.xlu0 %v222_v33 }
 0x1c4   :  { %226 = vadd.xlane.f32.xlu0 %v225_v35 }
 0x24d   :  { %v224_v36 = vpop.xlane.xlu0 %223 }
 0x24e   :  { %v229_v37 = vmul.f32 0.03125, %v224_v36 }
 0x250   :  { %v231_v38 = vsub.f32 %v220_v32, %v229_v37 }
 0x251   :  { %v227_v39 = vpop.xlane.xlu0 %226 }
 0x252   :  { %v230_v40 = vmul.f32 0.03125, %v227_v39  ;;  %v233_v41 = vmul.f32 %v231_v38, %v231_v38 }
 0x254   :  { %v232_v42 = vsub.f32 %v221_v34, %v230_v40  ;;  %v235_v43 = vsel %vm39_vm0, %v233_v41, 0.0 }
 0x255   :  { %236 = vadd.xlane.f32.xlu1 %v235_v43 }
 0x256   :  { %v234_v44 = vmul.f32 %v232_v42, %v232_v42 }
 0x258   :  { %v238_v45 = vsel %vm39_vm0, %v234_v44, 0.0 }
 0x259   :  { %239 = vadd.xlane.f32.xlu1 %v238_v45 }
 0x2e2   :  { %v237_v46 = vpop.xlane.xlu1 %236 }
 0x2e3   :  { %v241_v47 = vmul.f32 0.03125, %v237_v46 }
 0x2e5   :  { %v243_v48 = vadd.f32 1e-05, %v241_v47 }
 0x2e6   :  { %v240_v49 = vpop.xlane.xlu1 %239 }
 0x2e7   :  { %351 = vrsqrt.f32 %v243_v48  ;;  %v242_v50 = vmul.f32 0.03125, %v240_v49 }
 0x2e9   :  { %v244_v51 = vadd.f32 1e-05, %v242_v50 }
 0x2eb   :  { %353 = vrsqrt.f32 %v244_v51 }
 0x2f1   :  { %v352_v52 = vpop.eup %351 }
 0x2f2   :  { %v247_v54 = vmul.f32 %v352_v52, %v231_v38 }
 0x2f4   :  { %v256_v56 = vmul.f32 %v279_v53, %v247_v54 }
 0x2f5   :  { %v354_v57 = vpop.eup %353 }
 0x2f6   :  { %v265_v58 = vadd.f32 %v280_v55, %v256_v56  ;;  %v248_v59 = vmul.f32 %v354_v57, %v232_v42 }
 0x2f8   :  { %267 = vst.msk [vmem:[%s470_s7] sm:$0xff] %vm39_vm0, %v265_v58  ;;  %v257_v60 = vmul.f32 %v279_v53, %v248_v59 }
 0x2fa   :  { %v266_v61 = vadd.f32 %v280_v55, %v257_v60 }
 0x2fc   :  { %268 = vst.msk [vmem:[%s470_s7 + $0x8] sm:$0xff] %vm39_vm0, %v266_v61 }

</bundles_post_ra>
